<compile_context>
chip_gen: v7x
topology: tpu7x:2x2x1
jax: 0.10.0
libtpu: 0.0.40
codegen_flags: <defaults>
</compile_context>

<pallas_src>
import functools

import jax
import jax.numpy as jnp
from jax.experimental import pallas as pl
from jax.experimental.pallas import tpu as pltpu


def _round_up(x: int, m: int) -> int:
    return ((x + m - 1) // m) * m


def _poly_pow(a, n: int):
    """a ** n for static n >= 1 via square-and-multiply (VPU vmuls)."""
    result = None
    base = a
    e = n
    while e:
        if e & 1:
            result = base if result is None else result * base
        e >>= 1
        if e:
            base = base * base
    return result


def _vmem_capacity_bytes() -> int:
    """Per-core VMEM capacity; conservative (v7x-sized) default if unavailable."""
    try:
        info = pltpu.get_tpu_info()
        cap = getattr(info, "vmem_capacity_bytes", None)
        if cap:
            return int(cap)
    except Exception:
        pass
    return 64 << 20


# ----------------------------- kernels ------------------------------------- #

def _drm_kernel_resident(x_ref, w_ref, b_ref, o_ref, *, n_linear: int, n_pow: int, mc: int):
    """All layer weights resident in VMEM; batch tile processed in row sub-chunks."""
    tb = x_ref.shape[0]
    for s in range(0, tb, mc):                       # static sub-chunk loop
        size = min(mc, tb - s)
        rows = pl.ds(s, size)
        x = x_ref[rows, :]                           # native activation dtype
        h = x
        for l in range(n_linear):                    # static unroll over layers
            acc = jnp.dot(h, w_ref[l], preferred_element_type=jnp.float32) + b_ref[l]
            acc = jnp.maximum(acc, 0.0)
            p = _poly_pow(acc, n_pow)
            # Keep the final layer in f32 — the residual add is f32 anyway.
            h = p if l == n_linear - 1 else p.astype(x_ref.dtype)
        o_ref[rows, :] = (x.astype(jnp.float32) + h).astype(o_ref.dtype)


def _drm_kernel_stream(x_ref, w_ref, b_ref, o_ref, h_ref, *, n_linear: int, n_pow: int, mc: int):
    """One layer per grid step (weights streamed); activation carried in VMEM scratch."""
    l = pl.program_id(1)
    tb = x_ref.shape[0]

    @pl.when(l == 0)
    def _():
        h_ref[...] = x_ref[...]

    for s in range(0, tb, mc):                       # static sub-chunk loop
        size = min(mc, tb - s)
        rows = pl.ds(s, size)
        acc = jnp.dot(h_ref[rows, :], w_ref[0], preferred_element_type=jnp.float32) + b_ref[0]
        acc = jnp.maximum(acc, 0.0)
        h_ref[rows, :] = _poly_pow(acc, n_pow).astype(h_ref.dtype)

    @pl.when(l == n_linear - 1)
    def _():
        for s in range(0, tb, mc):
            size = min(mc, tb - s)
            rows = pl.ds(s, size)
            o_ref[rows, :] = (x_ref[rows, :].astype(jnp.float32)
                              + h_ref[rows, :].astype(jnp.float32)).astype(o_ref.dtype)


# ----------------------------- wrappers ------------------------------------ #

def prepare_drm_params(weights, biases):
    """One-time parameter layout prep (hoisted out of the per-call path).

    weights: list of (width, width) PyTorch-layout (out_features, in_features) matrices
    biases:  list of (width,) vectors
    Returns:
      w_stack (n_linear, Wp, Wp): transposed to (in, out), zero-padded, native dtype
      b_stack (n_linear, 1, Wp):  f32, zero-padded
    """
    W = weights[0].shape[0]
    Wp = max(128, _round_up(W, 128))
    w_stack = jnp.stack(
        [jnp.pad(jnp.transpose(w), ((0, Wp - W), (0, Wp - W))) for w in weights])
    b_stack = jnp.stack(
        [jnp.pad(b.astype(jnp.float32).reshape(1, W), ((0, 0), (0, Wp - W))) for b in biases])
    return w_stack, b_stack


def drm_block(x, w_stack, b_stack, *, n_pow: int = 3, tb: int = 256, force_streaming: bool = False):
    """Pallas DRM block.  x: (batch, width); w_stack/b_stack from prepare_drm_params."""
    n_linear, Wp, _ = w_stack.shape
    B, W = x.shape
    assert W <= Wp and Wp % 128 == 0

    act_dtype = x.dtype
    itemsize = jnp.dtype(act_dtype).itemsize
    w_itemsize = jnp.dtype(w_stack.dtype).itemsize
    sub = max(8, 32 // itemsize)                     # sublane granularity for this dtype

    # ---- batch tile: multiple of `sub`, >=2 grid steps when the batch allows ----
    tb = min(tb, _round_up(B, sub))
    if B > sub:                                      # keep both v7x TensorCores busy
        tb = min(tb, _round_up(pl.cdiv(B, 2), sub))
    tb = max(tb, sub)
    Bp = _round_up(B, tb)
    n_tiles = Bp // tb

    # ---- in-kernel row sub-chunk (~8 vregs per (mc, Wp) activation temp) ----
    mc = (8 * 1024 * (4 // itemsize)) // Wp
    mc = max(sub, min(128, (mc // sub) * sub))
    mc = min(mc, tb)

    # ---- generation-aware VMEM budget ----
    cap = _vmem_capacity_bytes()
    vmem_budget = min(cap - (6 << 20), cap * 7 // 8)   # ~112 MiB on 128-MiB parts, ~56 MiB on v7x

    w_bytes = n_linear * Wp * Wp * w_itemsize
    b_bytes = n_linear * 8 * Wp * 4                    # (., 1, Wp) pads to 8 sublanes
    io_bytes = 4 * tb * Wp * itemsize                  # double-buffered x + out tiles
    head = 2 << 20
    need_single = w_bytes + b_bytes + io_bytes + head
    need_double = 2 * (w_bytes + b_bytes) + io_bytes + head
    need_stream = 2 * (Wp * Wp * w_itemsize + 8 * Wp * 4) + io_bytes + tb * Wp * itemsize + head

    use_streaming = force_streaming or (need_single > vmem_budget)

    # ---- wrapper-side zero padding (keeps the math exact) ----
    x_p = jnp.pad(x, ((0, Bp - B), (0, Wp - W)))

    def _resident(weight_mode):
        extra = {} if weight_mode is None else {"pipeline_mode": weight_mode}
        return pl.pallas_call(
            functools.partial(_drm_kernel_resident, n_linear=n_linear, n_pow=n_pow, mc=mc),
            out_shape=jax.ShapeDtypeStruct((Bp, Wp), act_dtype),
            grid_spec=pltpu.PrefetchScalarGridSpec(
                num_scalar_prefetch=0,
                grid=(n_tiles,),
                in_specs=[
                    pl.BlockSpec((tb, Wp), lambda i: (i, 0)),                        # x tile
                    pl.BlockSpec((n_linear, Wp, Wp), lambda i: (0, 0, 0), **extra),  # weights (resident)
                    pl.BlockSpec((n_linear, 1, Wp), lambda i: (0, 0, 0), **extra),   # biases  (resident)
                ],
                out_specs=pl.BlockSpec((tb, Wp), lambda i: (i, 0)),
            ),
            compiler_params=pltpu.CompilerParams(
                dimension_semantics=("parallel",),
                vmem_limit_bytes=int(min(max(need_double, 32 << 20), vmem_budget)),
            ),
        )

    def _streaming():
        return pl.pallas_call(
            functools.partial(_drm_kernel_stream, n_linear=n_linear, n_pow=n_pow, mc=mc),
            out_shape=jax.ShapeDtypeStruct((Bp, Wp), act_dtype),
            grid_spec=pltpu.PrefetchScalarGridSpec(
                num_scalar_prefetch=0,
                grid=(n_tiles, n_linear),                    # layer axis last / 'arbitrary'
                in_specs=[
                    pl.BlockSpec((tb, Wp), lambda i, l: (i, 0)),
                    pl.BlockSpec((1, Wp, Wp), lambda i, l: (l, 0, 0)),   # one layer's weights per step
                    pl.BlockSpec((1, 1, Wp), lambda i, l: (l, 0, 0)),
                ],
                out_specs=pl.BlockSpec((tb, Wp), lambda i, l: (i, 0)),
                scratch_shapes=[pltpu.VMEM((tb, Wp), act_dtype)],        # carried activation
            ),
            compiler_params=pltpu.CompilerParams(
                dimension_semantics=("parallel", "arbitrary"),
                vmem_limit_bytes=int(min(max(need_stream, 32 << 20), vmem_budget)),
            ),
        )

    if use_streaming:
        out_p = _streaming()(x_p, w_stack, b_stack)
    else:
        try:
            # Grid-invariant weights: single-buffered to halve resident footprint.
            out_p = _resident(pl.Buffered(1))(x_p, w_stack, b_stack)
        except Exception:
            try:
                out_p = _resident(None)(x_p, w_stack, b_stack)       # default double-buffering
            except Exception:
                out_p = _streaming()(x_p, w_stack, b_stack)          # last resort: stream weights

    return out_p[:B, :W]


def drm_block_reference(x, weights, biases, n_pow=3):
    """Pure-JAX reference for correctness check (f32 math)."""
    h = x.astype(jnp.float32)
    for w, b in zip(weights, biases):
        h = h @ w.T.astype(jnp.float32) + b.astype(jnp.float32)
        h = jnp.maximum(h, 0.0) ** n_pow
    return (x.astype(jnp.float32) + h).astype(x.dtype)


if __name__ == "__main__":
    width, n_linear, n_pow = 32, 2, 3

    key = jax.random.PRNGKey(0)
    kx, kx2, *kparams = jax.random.split(key, 2 + 2 * n_linear)

    # Deterministic init mimicking nn.Linear default: U(-1/sqrt(width), 1/sqrt(width)),
    # weights in PyTorch layout (out_features, in_features).
    bound = 1.0 / (width ** 0.5)
    weights, biases = [], []
    for l in range(n_linear):
        kw, kb = kparams[2 * l], kparams[2 * l + 1]
        weights.append(jax.random.uniform(kw, (width, width), jnp.float32, -bound, bound))
        biases.append(jax.random.uniform(kb, (width,), jnp.float32, -bound, bound))

    # Parameter prep hoisted out of the per-call path (done once).
    w_stack, b_stack = prepare_drm_params(weights, biases)

    # 1) Small batch through the resident-weights path.
    x1 = jax.random.normal(kx, (8, width), dtype=jnp.float32)
    out1 = jax.block_until_ready(drm_block(x1, w_stack, b_stack, n_pow=n_pow))
    ref1 = drm_block_reference(x1, weights, biases, n_pow=n_pow)
    assert out1.shape == (8, width)
    assert jnp.allclose(out1, ref1, atol=1e-5, rtol=1e-5), "resident-path mismatch vs reference"

    # 2) Same inputs through the weight-streaming fallback (large-width path).
    out2 = jax.block_until_ready(drm_block(x1, w_stack, b_stack, n_pow=n_pow, force_streaming=True))
    assert jnp.allclose(out2, ref1, atol=1e-5, rtol=1e-5), "streaming-path mismatch vs reference"

    # 3) Bigger batch: exercises the >=2-step parallel grid and uneven sub-chunks.
    x2 = jax.random.normal(kx2, (160, width), dtype=jnp.float32)
    out3 = jax.block_until_ready(drm_block(x2, w_stack, b_stack, n_pow=n_pow))
    ref3 = drm_block_reference(x2, weights, biases, n_pow=n_pow)
    assert jnp.allclose(out3, ref3, atol=1e-5, rtol=1e-5), "multi-tile mismatch vs reference"

    print("KERNEL_OK")
</pallas_src>

<mosaic_0001>
module attributes {stable_mosaic.version = 11 : i64} {
  func.func @_drm_kernel_resident(%arg0: i32, %arg1: memref<8x128xf32, #tpu.memory_space<vmem>>, %arg2: memref<2x128x128xf32, #tpu.memory_space<vmem>>, %arg3: memref<2x1x128xf32, #tpu.memory_space<vmem>>, %arg4: memref<8x128xf32, #tpu.memory_space<vmem>>) attributes {dimension_semantics = [#tpu.dimension_semantics<parallel>], iteration_bounds = array<i64: 1>, scalar_prefetch = 0 : i64, scratch_operands = 0 : i64, tpu.core_type = #tpu.core_type<tc>, window_params = [{transform_indices = @transform_0, window_bounds = array<i64: 8, 128>}, {pipeline_mode = #tpu.pipeline_mode<synchronous>, transform_indices = @transform_1, window_bounds = array<i64: 2, 128, 128>}, {pipeline_mode = #tpu.pipeline_mode<synchronous>, transform_indices = @transform_2, window_bounds = array<i64: 2, 1, 128>}, {transform_indices = @transform_3, window_bounds = array<i64: 8, 128>}]} {
    %c0 = arith.constant 0 : index
    %c0_0 = arith.constant 0 : index
    %0 = vector.load %arg1[%c0, %c0_0] : memref<8x128xf32, #tpu.memory_space<vmem>>, vector<8x128xf32>
    %c0_1 = arith.constant 0 : index
    %c0_2 = arith.constant 0 : index
    %c0_3 = arith.constant 0 : index
    %1 = vector.load %arg2[%c0_1, %c0_2, %c0_3] : memref<2x128x128xf32, #tpu.memory_space<vmem>>, vector<1x128x128xf32>
    %2 = vector.shape_cast %1 : vector<1x128x128xf32> to vector<128x128xf32>
    %cst = arith.constant dense<0.000000e+00> : vector<8x128xf32>
    %3 = tpu.matmul %0, %2, %cst {dimension_numbers = #tpu.dot_dimension_numbers<[1], [0], [0], [1], [0, 0, 1, 1], [], []>} : vector<8x128xf32>, vector<128x128xf32>, vector<8x128xf32> -> vector<8x128xf32>
    %c0_4 = arith.constant 0 : index
    %c0_5 = arith.constant 0 : index
    %c0_6 = arith.constant 0 : index
    %4 = vector.load %arg3[%c0_4, %c0_5, %c0_6] : memref<2x1x128xf32, #tpu.memory_space<vmem>>, vector<1x1x128xf32>
    %5 = vector.shape_cast %4 : vector<1x1x128xf32> to vector<1x128xf32>
    %6 = vector.broadcast %5 : vector<1x128xf32> to vector<8x128xf32>
    %7 = arith.addf %3, %6 : vector<8x128xf32>
    %cst_7 = arith.constant 0.000000e+00 : f32
    %8 = vector.broadcast %cst_7 : f32 to vector<8x128xf32>
    %9 = arith.maximumf %7, %8 : vector<8x128xf32>
    %10 = arith.mulf %9, %9 : vector<8x128xf32>
    %11 = arith.mulf %9, %10 : vector<8x128xf32>
    %c1 = arith.constant 1 : index
    %c0_8 = arith.constant 0 : index
    %c0_9 = arith.constant 0 : index
    %12 = vector.load %arg2[%c1, %c0_8, %c0_9] : memref<2x128x128xf32, #tpu.memory_space<vmem>>, vector<1x128x128xf32>
    %13 = vector.shape_cast %12 : vector<1x128x128xf32> to vector<128x128xf32>
    %cst_10 = arith.constant dense<0.000000e+00> : vector<8x128xf32>
    %14 = tpu.matmul %11, %13, %cst_10 {dimension_numbers = #tpu.dot_dimension_numbers<[1], [0], [0], [1], [0, 0, 1, 1], [], []>} : vector<8x128xf32>, vector<128x128xf32>, vector<8x128xf32> -> vector<8x128xf32>
    %c1_11 = arith.constant 1 : index
    %c0_12 = arith.constant 0 : index
    %c0_13 = arith.constant 0 : index
    %15 = vector.load %arg3[%c1_11, %c0_12, %c0_13] : memref<2x1x128xf32, #tpu.memory_space<vmem>>, vector<1x1x128xf32>
    %16 = vector.shape_cast %15 : vector<1x1x128xf32> to vector<1x128xf32>
    %17 = vector.broadcast %16 : vector<1x128xf32> to vector<8x128xf32>
    %18 = arith.addf %14, %17 : vector<8x128xf32>
    %cst_14 = arith.constant 0.000000e+00 : f32
    %19 = vector.broadcast %cst_14 : f32 to vector<8x128xf32>
    %20 = arith.maximumf %18, %19 : vector<8x128xf32>
    %21 = arith.mulf %20, %20 : vector<8x128xf32>
    %22 = arith.mulf %20, %21 : vector<8x128xf32>
    %23 = arith.addf %0, %22 : vector<8x128xf32>
    %c0_15 = arith.constant 0 : index
    %c0_16 = arith.constant 0 : index
    %24 = vector.load %arg4[%c0_15, %c0_16] : memref<8x128xf32, #tpu.memory_space<vmem>>, vector<8x128xf32>
    tpu.vector_store %arg4[%c0_15, %c0_16], %23 {strides = array<i32>} : memref<8x128xf32, #tpu.memory_space<vmem>>, vector<8x128xf32>,
    return
  }
  func.func @transform_0(%arg0: i32) -> (i32, i32) {
    %c0_i32 = arith.constant 0 : i32
    %c0_i32_0 = arith.constant 0 : i32
    return %arg0, %c0_i32 : i32, i32
  }
  func.func @transform_1(%arg0: i32) -> (i32, i32, i32) {
    %c0_i32 = arith.constant 0 : i32
    %c0_i32_0 = arith.constant 0 : i32
    %c0_i32_1 = arith.constant 0 : i32
    %c0_i32_2 = arith.constant 0 : i32
    return %c0_i32, %c0_i32_0, %c0_i32_1 : i32, i32, i32
  }
  func.func @transform_2(%arg0: i32) -> (i32, i32, i32) {
    %c0_i32 = arith.constant 0 : i32
    %c0_i32_0 = arith.constant 0 : i32
    %c0_i32_1 = arith.constant 0 : i32
    %c0_i32_2 = arith.constant 0 : i32
    return %c0_i32, %c0_i32_0, %c0_i32_1 : i32, i32, i32
  }
  func.func @transform_3(%arg0: i32) -> (i32, i32) {
    %c0_i32 = arith.constant 0 : i32
    %c0_i32_0 = arith.constant 0 : i32
    return %arg0, %c0_i32 : i32, i32
  }
}

module attributes {stable_mosaic.version = 11 : i64} {
  func.func @_drm_kernel_resident(%arg0: i32, %arg1: memref<8x128xf32, #tpu.memory_space<vmem>>, %arg2: memref<2x128x128xf32, #tpu.memory_space<vmem>>, %arg3: memref<2x1x128xf32, #tpu.memory_space<vmem>>, %arg4: memref<8x128xf32, #tpu.memory_space<vmem>>) attributes {dimension_semantics = [#tpu.dimension_semantics<parallel>], iteration_bounds = array<i64: 1>, scalar_prefetch = 0 : i64, scratch_operands = 0 : i64, tpu.core_type = #tpu.core_type<tc>, window_params = [{transform_indices = @transform_0, window_bounds = array<i64: 8, 128>}, {pipeline_mode = #tpu.pipeline_mode<synchronous>, transform_indices = @transform_1, window_bounds = array<i64: 2, 128, 128>}, {pipeline_mode = #tpu.pipeline_mode<synchronous>, transform_indices = @transform_2, window_bounds = array<i64: 2, 1, 128>}, {transform_indices = @transform_3, window_bounds = array<i64: 8, 128>}]} {
    %c0 = arith.constant 0 : index
    %c0_0 = arith.constant 0 : index
    %0 = vector.load %arg1[%c0, %c0_0] : memref<8x128xf32, #tpu.memory_space<vmem>>, vector<8x128xf32>
    %c0_1 = arith.constant 0 : index
    %c0_2 = arith.constant 0 : index
    %c0_3 = arith.constant 0 : index
    %1 = vector.load %arg2[%c0_1, %c0_2, %c0_3] : memref<2x128x128xf32, #tpu.memory_space<vmem>>, vector<1x128x128xf32>
    %2 = vector.shape_cast %1 : vector<1x128x128xf32> to vector<128x128xf32>
    %cst = arith.constant dense<0.000000e+00> : vector<8x128xf32>
    %3 = tpu.matmul %0, %2, %cst {dimension_numbers = #tpu.dot_dimension_numbers<[1], [0], [0], [1], [0, 0, 1, 1], [], []>} : vector<8x128xf32>, vector<128x128xf32>, vector<8x128xf32> -> vector<8x128xf32>
    %c0_4 = arith.constant 0 : index
    %c0_5 = arith.constant 0 : index
    %c0_6 = arith.constant 0 : index
    %4 = vector.load %arg3[%c0_4, %c0_5, %c0_6] : memref<2x1x128xf32, #tpu.memory_space<vmem>>, vector<1x1x128xf32>
    %5 = vector.shape_cast %4 : vector<1x1x128xf32> to vector<1x128xf32>
    %6 = vector.broadcast %5 : vector<1x128xf32> to vector<8x128xf32>
    %7 = arith.addf %3, %6 : vector<8x128xf32>
    %cst_7 = arith.constant 0.000000e+00 : f32
    %8 = vector.broadcast %cst_7 : f32 to vector<8x128xf32>
    %9 = arith.maximumf %7, %8 : vector<8x128xf32>
    %10 = arith.mulf %9, %9 : vector<8x128xf32>
    %11 = arith.mulf %9, %10 : vector<8x128xf32>
    %c1 = arith.constant 1 : index
    %c0_8 = arith.constant 0 : index
    %c0_9 = arith.constant 0 : index
    %12 = vector.load %arg2[%c1, %c0_8, %c0_9] : memref<2x128x128xf32, #tpu.memory_space<vmem>>, vector<1x128x128xf32>
    %13 = vector.shape_cast %12 : vector<1x128x128xf32> to vector<128x128xf32>
    %cst_10 = arith.constant dense<0.000000e+00> : vector<8x128xf32>
    %14 = tpu.matmul %11, %13, %cst_10 {dimension_numbers = #tpu.dot_dimension_numbers<[1], [0], [0], [1], [0, 0, 1, 1], [], []>} : vector<8x128xf32>, vector<128x128xf32>, vector<8x128xf32> -> vector<8x128xf32>
    %c1_11 = arith.constant 1 : index
    %c0_12 = arith.constant 0 : index
    %c0_13 = arith.constant 0 : index
    %15 = vector.load %arg3[%c1_11, %c0_12, %c0_13] : memref<2x1x128xf32, #tpu.memory_space<vmem>>, vector<1x1x128xf32>
    %16 = vector.shape_cast %15 : vector<1x1x128xf32> to vector<1x128xf32>
    %17 = vector.broadcast %16 : vector<1x128xf32> to vector<8x128xf32>
    %18 = arith.addf %14, %17 : vector<8x128xf32>
    %cst_14 = arith.constant 0.000000e+00 : f32
    %19 = vector.broadcast %cst_14 : f32 to vector<8x128xf32>
    %20 = arith.maximumf %18, %19 : vector<8x128xf32>
    %21 = arith.mulf %20, %20 : vector<8x128xf32>
    %22 = arith.mulf %20, %21 : vector<8x128xf32>
    %23 = arith.addf %0, %22 : vector<8x128xf32>
    %c0_15 = arith.constant 0 : index
    %c0_16 = arith.constant 0 : index
    %24 = vector.load %arg4[%c0_15, %c0_16] : memref<8x128xf32, #tpu.memory_space<vmem>>, vector<8x128xf32>
    tpu.vector_store %arg4[%c0_15, %c0_16], %23 {strides = array<i32>} : memref<8x128xf32, #tpu.memory_space<vmem>>, vector<8x128xf32>,
    return
  }
  func.func @transform_0(%arg0: i32) -> (i32, i32) {
    %c0_i32 = arith.constant 0 : i32
    %c0_i32_0 = arith.constant 0 : i32
    return %arg0, %c0_i32 : i32, i32
  }
  func.func @transform_1(%arg0: i32) -> (i32, i32, i32) {
    %c0_i32 = arith.constant 0 : i32
    %c0_i32_0 = arith.constant 0 : i32
    %c0_i32_1 = arith.constant 0 : i32
    %c0_i32_2 = arith.constant 0 : i32
    return %c0_i32, %c0_i32_0, %c0_i32_1 : i32, i32, i32
  }
  func.func @transform_2(%arg0: i32) -> (i32, i32, i32) {
    %c0_i32 = arith.constant 0 : i32
    %c0_i32_0 = arith.constant 0 : i32
    %c0_i32_1 = arith.constant 0 : i32
    %c0_i32_2 = arith.constant 0 : i32
    return %c0_i32, %c0_i32_0, %c0_i32_1 : i32, i32, i32
  }
  func.func @transform_3(%arg0: i32) -> (i32, i32) {
    %c0_i32 = arith.constant 0 : i32
    %c0_i32_0 = arith.constant 0 : i32
    return %arg0, %c0_i32 : i32, i32
  }
}

module attributes {stable_mosaic.version = 11 : i64} {
  func.func @_drm_kernel_stream(%arg0: i32, %arg1: i32, %arg2: memref<8x128xf32, #tpu.memory_space<vmem>>, %arg3: memref<1x128x128xf32, #tpu.memory_space<vmem>>, %arg4: memref<1x1x128xf32, #tpu.memory_space<vmem>>, %arg5: memref<8x128xf32, #tpu.memory_space<vmem>>, %arg6: memref<8x128xf32, #tpu.memory_space<vmem>>) attributes {dimension_semantics = [#tpu.dimension_semantics<parallel>, #tpu.dimension_semantics<arbitrary>], iteration_bounds = array<i64: 1, 2>, scalar_prefetch = 0 : i64, scratch_operands = 1 : i64, tpu.core_type = #tpu.core_type<tc>, window_params = [{transform_indices = @transform_0, window_bounds = array<i64: 8, 128>}, {transform_indices = @transform_1, window_bounds = array<i64: 1, 128, 128>}, {transform_indices = @transform_2, window_bounds = array<i64: 1, 1, 128>}, {transform_indices = @transform_3, window_bounds = array<i64: 8, 128>}]} {
    %c0_i32 = arith.constant 0 : i32
    %0 = arith.cmpi eq, %arg1, %c0_i32 : i32
    %1 = arith.extui %0 : i1 to i32
    %c0_i32_0 = arith.constant 0 : i32
    %2 = arith.cmpi ne, %1, %c0_i32_0 : i32
    scf.if %2 {
      %c0_12 = arith.constant 0 : index
      %c0_13 = arith.constant 0 : index
      %19 = vector.load %arg2[%c0_12, %c0_13] : memref<8x128xf32, #tpu.memory_space<vmem>>, vector<8x128xf32>
      %c0_14 = arith.constant 0 : index
      %c0_15 = arith.constant 0 : index
      %20 = vector.load %arg6[%c0_14, %c0_15] : memref<8x128xf32, #tpu.memory_space<vmem>>, vector<8x128xf32>
      tpu.vector_store %arg6[%c0_14, %c0_15], %19 {strides = array<i32>} : memref<8x128xf32, #tpu.memory_space<vmem>>, vector<8x128xf32>,
    } else {
    }
    %c0 = arith.constant 0 : index
    %c0_1 = arith.constant 0 : index
    %3 = vector.load %arg6[%c0, %c0_1] : memref<8x128xf32, #tpu.memory_space<vmem>>, vector<8x128xf32>
    %c0_2 = arith.constant 0 : index
    %c0_3 = arith.constant 0 : index
    %c0_4 = arith.constant 0 : index
    %4 = vector.load %arg3[%c0_2, %c0_3, %c0_4] : memref<1x128x128xf32, #tpu.memory_space<vmem>>, vector<1x128x128xf32>
    %5 = vector.shape_cast %4 : vector<1x128x128xf32> to vector<128x128xf32>
    %cst = arith.constant dense<0.000000e+00> : vector<8x128xf32>
    %6 = tpu.matmul %3, %5, %cst {dimension_numbers = #tpu.dot_dimension_numbers<[1], [0], [0], [1], [0, 0, 1, 1], [], []>} : vector<8x128xf32>, vector<128x128xf32>, vector<8x128xf32> -> vector<8x128xf32>
    %c0_5 = arith.constant 0 : index
    %c0_6 = arith.constant 0 : index
    %c0_7 = arith.constant 0 : index
    %7 = vector.load %arg4[%c0_5, %c0_6, %c0_7] : memref<1x1x128xf32, #tpu.memory_space<vmem>>, vector<1x1x128xf32>
    %8 = vector.shape_cast %7 : vector<1x1x128xf32> to vector<1x128xf32>
    %9 = vector.broadcast %8 : vector<1x128xf32> to vector<8x128xf32>
    %10 = arith.addf %6, %9 : vector<8x128xf32>
    %cst_8 = arith.constant 0.000000e+00 : f32
    %11 = vector.broadcast %cst_8 : f32 to vector<8x128xf32>
    %12 = arith.maximumf %10, %11 : vector<8x128xf32>
    %13 = arith.mulf %12, %12 : vector<8x128xf32>
    %14 = arith.mulf %12, %13 : vector<8x128xf32>
    %c0_9 = arith.constant 0 : index
    %c0_10 = arith.constant 0 : index
    %15 = vector.load %arg6[%c0_9, %c0_10] : memref<8x128xf32, #tpu.memory_space<vmem>>, vector<8x128xf32>
    tpu.vector_store %arg6[%c0_9, %c0_10], %14 {strides = array<i32>} : memref<8x128xf32, #tpu.memory_space<vmem>>, vector<8x128xf32>,
    %c1_i32 = arith.constant 1 : i32
    %16 = arith.cmpi eq, %arg1, %c1_i32 : i32
    %17 = arith.extui %16 : i1 to i32
    %c0_i32_11 = arith.constant 0 : i32
    %18 = arith.cmpi ne, %17, %c0_i32_11 : i32
    scf.if %18 {
      %c0_12 = arith.constant 0 : index
      %c0_13 = arith.constant 0 : index
      %19 = vector.load %arg2[%c0_12, %c0_13] : memref<8x128xf32, #tpu.memory_space<vmem>>, vector<8x128xf32>
      %c0_14 = arith.constant 0 : index
      %c0_15 = arith.constant 0 : index
      %20 = vector.load %arg6[%c0_14, %c0_15] : memref<8x128xf32, #tpu.memory_space<vmem>>, vector<8x128xf32>
      %21 = arith.addf %19, %20 : vector<8x128xf32>
      %c0_16 = arith.constant 0 : index
      %c0_17 = arith.constant 0 : index
      %22 = vector.load %arg5[%c0_16, %c0_17] : memref<8x128xf32, #tpu.memory_space<vmem>>, vector<8x128xf32>
      tpu.vector_store %arg5[%c0_16, %c0_17], %21 {strides = array<i32>} : memref<8x128xf32, #tpu.memory_space<vmem>>, vector<8x128xf32>,
    } else {
    }
    return
  }
  func.func @transform_0(%arg0: i32, %arg1: i32) -> (i32, i32) {
    %c0_i32 = arith.constant 0 : i32
    %c0_i32_0 = arith.constant 0 : i32
    return %arg0, %c0_i32 : i32, i32
  }
  func.func @transform_1(%arg0: i32, %arg1: i32) -> (i32, i32, i32) {
    %c0_i32 = arith.constant 0 : i32
    %c0_i32_0 = arith.constant 0 : i32
    %c0_i32_1 = arith.constant 0 : i32
    return %arg1, %c0_i32, %c0_i32_0 : i32, i32, i32
  }
  func.func @transform_2(%arg0: i32, %arg1: i32) -> (i32, i32, i32) {
    %c0_i32 = arith.constant 0 : i32
    %c0_i32_0 = arith.constant 0 : i32
    %c0_i32_1 = arith.constant 0 : i32
    return %arg1, %c0_i32, %c0_i32_0 : i32, i32, i32
  }
  func.func @transform_3(%arg0: i32, %arg1: i32) -> (i32, i32) {
    %c0_i32 = arith.constant 0 : i32
    %c0_i32_0 = arith.constant 0 : i32
    return %arg0, %c0_i32 : i32, i32
  }
}

</mosaic_0001>

<bundles_post_ra>
// kernel: tpu_custom_call.1
= control target key start
LH: loop header
LB: loop body
LE: loop exit
PB: predicated region body
PF: predicated region fallthrough
CT: control target
= control target key end

     0   :  { %8 = vsyncpa [#allocation3], 0  ;;  %s582_s0 = inlined_call_operand.hbm [shape: f32[8,128], index: 0, kind: input, shape index: {}]   ;;  %s583_s1 = inlined_call_operand.hbm [shape: f32[2,128,128], index: 1, kind: input, shape index: {}]   ;;  %s584_s2 = inlined_call_operand.vmem [shape: f32[2,1,128], index: 2, kind: input, shape index: {}]   ;;  %s585_s3 = inlined_call_operand.hbm [shape: f32[8,128], index: 3, kind: output, shape index: {}]  }
   0x1   :  { %9 = vsyncpa [#allocation6], 0 }
   0x2   :  { %10 = vsyncpa [#allocation4], 0  ;;  %s489_s12 = smov [#allocation2]   ;;  %s490_s14 = smov [#allocation5]  }
   0x3   :  { %s17_s13 = sshll.u32 %s489_s12, 4  ;;  %s26_s15 = sshll.u32 %s490_s14, 4  ;;  %s18_s13 = int_to_ptr.vmem [resolvable:$true] %s17_s13  ;;  %s517_s15 = int_to_ptr.vmem [resolvable:$true] %s26_s15 }
   0x4   :  { %s417_s18 = scalar_lea.hbm %s582_s0, 128 }
   0x5   :  { %p418_p0 = scmp.ne.s32.totalorder %s582_s0, %s417_s18  ;;  %p421_p1 = scmp.lt.u32.totalorder %s417_s18, %s582_s0 }
   0x7   :  { %p423_p2 = pnand %p421_p1, %p418_p0 }
   0x9   :  { %426 = shalt.err (!%p423_p2)
}
   0xa   :  { %s427_s23 = scalar_lea.vmem %s18_s13, 128  ;;  %p432_p4 = scmp.lt.s32.totalorder %s18_s13, %s18_s13 }
   0xb   :  { %p428_p3 = scmp.ne.s32.totalorder %s18_s13, %s427_s23  ;;  %p433_p5 = scmp.lt.s32.totalorder %s427_s23, %s427_s23 }
   0xd   :  { %p434_p6 = por %p433_p5, %p432_p4 }
   0xf   :  { %p435_p7 = pnand %p434_p6, %p428_p3 }
  0x11   :  { %438 = shalt.err (!%p435_p7)
}
  0x12   :  { %20 = dma.hbm_to_vmem [thread:$0]  %s582_s0, 128, %s18_s13, [#allocation3]  }
  0x13   :  { %s439_s28 = scalar_lea.hbm %s583_s1, 4096 }
  0x14   :  { %p440_p8 = scmp.ne.s32.totalorder %s583_s1, %s439_s28  ;;  %p443_p9 = scmp.lt.u32.totalorder %s439_s28, %s583_s1 }
  0x16   :  { %p445_p10 = pnand %p443_p9, %p440_p8 }
  0x18   :  { %448 = shalt.err (!%p445_p10)
}
  0x19   :  { %s449_s6 = scalar_lea.vmem %s517_s15, 4096  ;;  %p454_p12 = scmp.lt.s32.totalorder %s517_s15, %s517_s15 }
  0x1a   :  { %p450_p11 = scmp.ne.s32.totalorder %s517_s15, %s449_s6  ;;  %p455_p13 = scmp.lt.s32.totalorder %s449_s6, %s449_s6 }
  0x1c   :  { %p456_p0 = por %p455_p13, %p454_p12 }
  0x1e   :  { %p457_p1 = pnand %p456_p0, %p450_p11 }
  0x20   :  { %460 = shalt.err (!%p457_p1)
}
  0x21   :  { %s491_s0 = smov 128   ;;  %s492_s7 = smov 8  }
  0x22   :  { %32 = dma.hbm_to_vmem [thread:$0]  %s583_s1, 4096, %s517_s15, [#allocation6], %s491_s0, %s491_s0, %s492_s7  }
  0x23   :  { %483 = dma.done.wait [#allocation3], 128  }
  0x24   :  { %484 = vsyncadd [#allocation3], 4294967168 }
  0x25   :  { %485 = dma.done.wait [#allocation6], 4096  }
  0x26   :  { %486 = vsyncadd [#allocation6], 4294963200  ;;  %v493_v0 = vmov 0.0|0.0   ;;  %vm494_vm0 = vmmov 0   ;;  %v495_v1 = vmov 0.0   ;;  %v42_v2 = vld [vmem:[#allocation5] sm:$0xff] }
  0x27   :  { %361 = vmatprep.subr.bf16.mxu0 %v493_v0  ;;  %323 = vmatprep.mubr.msk.f32.mxu0 %vm494_vm0, %v495_v1  ;;  %v43_v3 = vld [vmem:[#allocation5 + $0x8] sm:$0xff]  ;;  %v44_v4 = vld [vmem:[#allocation5 + $0x10] sm:$0xff]  ;;  %v45_v6 = vld [vmem:[#allocation5 + $0x18] sm:$0xff]  ;;  %s496_s13 = smov [#allocation7]  }
  0x28   :  { %385 = vmatprep.subr.bf16.mxu1 %v493_v0  ;;  %358 = vmatprep.mubr.msk.f32.mxu1 %vm494_vm0, %v495_v1  ;;  %v362_v5 = vpack.c.bf16 %v43_v3, %v42_v2  ;;  %v365_v7 = vpack.c.bf16 %v45_v6, %v44_v4  ;;  %v46_v8 = vld [vmem:[#allocation5 + $0x20] sm:$0xff]  ;;  %v47_v9 = vld [vmem:[#allocation5 + $0x28] sm:$0xff]  ;;  %v141_v12 = vld [vmem:[#allocation5 + $0x90] sm:$0xff]  ;;  %s244_s14 = sshll.u32 %s496_s13, 4  ;;  %s245_s14 = int_to_ptr.vmem [resolvable:$true] %s244_s14 }
  0x29   :  { %v139_v10 = vld [vmem:[#allocation5 + $0x80] sm:$0xff]  ;;  %v140_v11 = vld [vmem:[#allocation5 + $0x88] sm:$0xff]  ;;  %v142_v13 = vld [vmem:[#allocation5 + $0x98] sm:$0xff]  ;;  %v368_v14 = vpack.c.bf16 %v47_v9, %v46_v8  ;;  %s461_s15 = scalar_lea.vmem %s245_s14, 128  ;;  %p466_p3 = scmp.lt.s32.totalorder %s245_s14, %s245_s14 }
  0x2a   :  { %363 = vmatpush3.bf16.msra.mxu0 %v362_v5  ;;  %v386_v15 = vpack.c.bf16 %v140_v11, %v139_v10  ;;  %v48_v16 = vld [vmem:[#allocation5 + $0x30] sm:$0xff]  ;;  %v49_v17 = vld [vmem:[#allocation5 + $0x38] sm:$0xff]  ;;  %v389_v18 = vpack.c.bf16 %v142_v13, %v141_v12  ;;  %v143_v19 = vld [vmem:[#allocation5 + $0xa0] sm:$0xff]  ;;  %p462_p2 = scmp.ne.s32.totalorder %s245_s14, %s461_s15  ;;  %p467_p4 = scmp.lt.s32.totalorder %s461_s15, %s461_s15 }
  0x2b   :  { %364 = vmatprep.subr.bf16.mxu0 %v493_v0  ;;  %v144_v20 = vld [vmem:[#allocation5 + $0xa8] sm:$0xff]  ;;  %v371_v21 = vpack.c.bf16 %v49_v17, %v48_v16  ;;  %v50_v22 = vld [vmem:[#allocation5 + $0x40] sm:$0xff]  ;;  %v145_v25 = vld [vmem:[#allocation5 + $0xb0] sm:$0xff] }
  0x2c   :  { %387 = vmatpush3.bf16.msra.mxu1 %v386_v15  ;;  %v51_v23 = vld [vmem:[#allocation5 + $0x48] sm:$0xff]  ;;  %v392_v24 = vpack.c.bf16 %v144_v20, %v143_v19  ;;  %v146_v26 = vld [vmem:[#allocation5 + $0xb8] sm:$0xff]  ;;  %v52_v28 = vld [vmem:[#allocation5 + $0x50] sm:$0xff]  ;;  %p468_p5 = por %p467_p4, %p466_p3 }
  0x2d   :  { %388 = vmatprep.subr.bf16.mxu1 %v493_v0  ;;  %v374_v27 = vpack.c.bf16 %v51_v23, %v50_v22  ;;  %v53_v29 = vld [vmem:[#allocation5 + $0x58] sm:$0xff]  ;;  %v395_v30 = vpack.c.bf16 %v146_v26, %v145_v25  ;;  %v147_v31 = vld [vmem:[#allocation5 + $0xc0] sm:$0xff]  ;;  %v148_v32 = vld [vmem:[#allocation5 + $0xc8] sm:$0xff] }
  0x2e   :  { %366 = vmatpush3.bf16.msra.mxu0 %v365_v7  ;;  %v377_v33 = vpack.c.bf16 %v53_v29, %v52_v28  ;;  %v54_v34 = vld [vmem:[#allocation5 + $0x60] sm:$0xff]  ;;  %v55_v35 = vld [vmem:[#allocation5 + $0x68] sm:$0xff]  ;;  %v398_v36 = vpack.c.bf16 %v148_v32, %v147_v31  ;;  %v149_v37 = vld [vmem:[#allocation5 + $0xd0] sm:$0xff]  ;;  %p469_p6 = pnand %p468_p5, %p462_p2 }
  0x2f   :  { %367 = vmatprep.subr.bf16.mxu0 %v493_v0  ;;  %v150_v38 = vld [vmem:[#allocation5 + $0xd8] sm:$0xff]  ;;  %v380_v39 = vpack.c.bf16 %v55_v35, %v54_v34  ;;  %v56_v40 = vld [vmem:[#allocation5 + $0x70] sm:$0xff]  ;;  %v151_v45 = vld [vmem:[#allocation5 + $0xe0] sm:$0xff] }
  0x30   :  { %390 = vmatpush3.bf16.msra.mxu1 %v389_v18  ;;  %v57_v41 = vld [vmem:[#allocation5 + $0x78] sm:$0xff]  ;;  %v401_v42 = vpack.c.bf16 %v150_v38, %v149_v37  ;;  %v152_v46 = vld [vmem:[#allocation5 + $0xe8] sm:$0xff]  ;;  %v153_v48 = vld [vmem:[#allocation5 + $0xf0] sm:$0xff] }
  0x31   :  { %391 = vmatprep.subr.bf16.mxu1 %v493_v0  ;;  %v383_v43 = vpack.c.bf16 %v57_v41, %v56_v40  ;;  %v41_v44 = vld [vmem:[#allocation2] sm:$0xff]  ;;  %v404_v47 = vpack.c.bf16 %v152_v46, %v151_v45 }
  0x32   :  { %369 = vmatpush3.bf16.msra.mxu0 %v368_v14  ;;  %v154_v49 = vld [vmem:[#allocation5 + $0xf8] sm:$0xff] }
  0x33   :  { %370 = vmatprep.subr.bf16.mxu0 %v493_v0  ;;  %v407_v50 = vpack.c.bf16 %v154_v49, %v153_v48  ;;  %v254_v51 = vld [vmem:[%s584_s2] ss:$0 sm:$0xff]  ;;  %v256_v58 = vld [vmem:[%s584_s2 + $0x1] ss:$0 sm:$0xff] }
  0x34   :  { %393 = vmatpush3.bf16.msra.mxu1 %v392_v24 }
  0x35   :  { %394 = vmatprep.subr.bf16.mxu1 %v493_v0 }
  0x36   :  { %372 = vmatpush3.bf16.msra.mxu0 %v371_v21 }
  0x37   :  { %373 = vmatprep.subr.bf16.mxu0 %v493_v0 }
  0x38   :  { %396 = vmatpush3.bf16.msra.mxu1 %v395_v30 }
  0x39   :  { %397 = vmatprep.subr.bf16.mxu1 %v493_v0 }
  0x3a   :  { %375 = vmatpush3.bf16.msra.mxu0 %v374_v27 }
  0x3b   :  { %376 = vmatprep.subr.bf16.mxu0 %v493_v0 }
  0x3c   :  { %399 = vmatpush3.bf16.msra.mxu1 %v398_v36 }
  0x3d   :  { %400 = vmatprep.subr.bf16.mxu1 %v493_v0 }
  0x3e   :  { %378 = vmatpush3.bf16.msra.mxu0 %v377_v33 }
  0x3f   :  { %379 = vmatprep.subr.bf16.mxu0 %v493_v0 }
  0x40   :  { %402 = vmatpush3.bf16.msra.mxu1 %v401_v42 }
  0x41   :  { %403 = vmatprep.subr.bf16.mxu1 %v493_v0 }
  0x42   :  { %381 = vmatpush3.bf16.msra.mxu0 %v380_v39 }
  0x43   :  { %382 = vmatprep.subr.bf16.mxu0 %v493_v0 }
  0x44   :  { %405 = vmatpush3.bf16.msra.mxu1 %v404_v47 }
  0x45   :  { %406 = vmatprep.subr.bf16.mxu1 %v493_v0 }
  0x46   :  { %384 = vmatpush3.bf16.msra.mxu0 %v383_v43 }
  0x48   :  { %408 = vmatpush3.bf16.msra.mxu1 %v407_v50 }
  0x49   :  { %324 = vmatmul.mubr.f32.vlgmr.msra.gmra.mrb[0].mxu0 %v41_v44 }
 0x11c   :  { %v131_v52 = vpop.f32.mrb[0].mxu0 }
 0x11d   :  { %v132_v53 = vadd.f32 %v254_v51, %v131_v52  ;;  %v325_v54 = vpop.f32.mrb[1].mxu0 }
 0x11f   :  { %v135_v55 = vmax.f32 %v132_v53, 0.0 }
 0x121   :  { %v136_v56 = vmul.f32 %v135_v55, %v135_v55 }
 0x123   :  { %v137_v57 = vmul.f32 %v136_v56, %v135_v55 }
 0x125   :  { %359 = vmatmul.mubr.f32.vlgmr.msra.gmra.mrb[0].mxu1 %v137_v57 }
 0x1f8   :  { %v229_v59 = vpop.f32.mrb[0].mxu1 }
 0x1f9   :  { %v230_v60 = vadd.f32 %v256_v58, %v229_v59  ;;  %v360_v61 = vpop.f32.mrb[1].mxu1 }
 0x1fb   :  { %v233_v62 = vmax.f32 %v230_v60, 0.0 }
 0x1fd   :  { %v234_v63 = vmul.f32 %v233_v62, %v233_v62 }
 0x1ff   :  { %v235_v0 = vmul.f32 %v234_v63, %v233_v62 }
 0x201   :  { %v236_v1 = vadd.f32 %v235_v0, %v41_v44 }
 0x203   :  { %237 = vst [vmem:[#allocation7] sm:$0xff] %v236_v1 }
 0x204   :  { %472 = shalt.err (!%p469_p6)
}
 0x205   :  { %s473_s17 = scalar_lea.hbm %s585_s3, 128 }
 0x206   :  { %p474_p7 = scmp.ne.s32.totalorder %s585_s3, %s473_s17  ;;  %p477_p8 = scmp.lt.u32.totalorder %s473_s17, %s585_s3 }
 0x208   :  { %p479_p9 = pnand %p477_p8, %p474_p7 }
 0x20a   :  { %482 = shalt.err (!%p479_p9)
}
 0x20b   :  { %247 = dma.vmem_to_hbm [thread:$0]  %s245_s14, 128, %s585_s3, [#allocation4]  }
 0x20c   :  { %487 = dma.done.wait [#allocation4], 128  }
 0x20d   :  { %488 = vsyncadd [#allocation4], 4294967168 }
 0x20e   :  { %251 = vsyncpa [#allocation3], 1 }
 0x20f   :  { %252 = vsyncpa [#allocation6], 1 }
 0x210   :  { %253 = vsyncpa [#allocation4], 1 }

// kernel: tpu_custom_call.1
= control target key start
LH: loop header
LB: loop body
LE: loop exit
PB: predicated region body
PF: predicated region fallthrough
CT: control target
= control target key end

     0   :  { %8 = vsyncpa [#allocation3], 0  ;;  %s582_s0 = inlined_call_operand.hbm [shape: f32[8,128], index: 0, kind: input, shape index: {}]   ;;  %s583_s1 = inlined_call_operand.hbm [shape: f32[2,128,128], index: 1, kind: input, shape index: {}]   ;;  %s584_s2 = inlined_call_operand.vmem [shape: f32[2,1,128], index: 2, kind: input, shape index: {}]   ;;  %s585_s3 = inlined_call_operand.hbm [shape: f32[8,128], index: 3, kind: output, shape index: {}]  }
   0x1   :  { %9 = vsyncpa [#allocation6], 0 }
   0x2   :  { %10 = vsyncpa [#allocation4], 0  ;;  %s489_s12 = smov [#allocation2]   ;;  %s490_s14 = smov [#allocation5]  }
   0x3   :  { %s17_s13 = sshll.u32 %s489_s12, 4  ;;  %s26_s15 = sshll.u32 %s490_s14, 4  ;;  %s18_s13 = int_to_ptr.vmem [resolvable:$true] %s17_s13  ;;  %s517_s15 = int_to_ptr.vmem [resolvable:$true] %s26_s15 }
   0x4   :  { %s417_s18 = scalar_lea.hbm %s582_s0, 128 }
   0x5   :  { %p418_p0 = scmp.ne.s32.totalorder %s582_s0, %s417_s18  ;;  %p421_p1 = scmp.lt.u32.totalorder %s417_s18, %s582_s0 }
   0x7   :  { %p423_p2 = pnand %p421_p1, %p418_p0 }
   0x9   :  { %426 = shalt.err (!%p423_p2)
}
   0xa   :  { %s427_s23 = scalar_lea.vmem %s18_s13, 128  ;;  %p432_p4 = scmp.lt.s32.totalorder %s18_s13, %s18_s13 }
   0xb   :  { %p428_p3 = scmp.ne.s32.totalorder %s18_s13, %s427_s23  ;;  %p433_p5 = scmp.lt.s32.totalorder %s427_s23, %s427_s23 }
   0xd   :  { %p434_p6 = por %p433_p5, %p432_p4 }
   0xf   :  { %p435_p7 = pnand %p434_p6, %p428_p3 }
  0x11   :  { %438 = shalt.err (!%p435_p7)
}
  0x12   :  { %20 = dma.hbm_to_vmem [thread:$0]  %s582_s0, 128, %s18_s13, [#allocation3]  }
  0x13   :  { %s439_s28 = scalar_lea.hbm %s583_s1, 4096 }
  0x14   :  { %p440_p8 = scmp.ne.s32.totalorder %s583_s1, %s439_s28  ;;  %p443_p9 = scmp.lt.u32.totalorder %s439_s28, %s583_s1 }
  0x16   :  { %p445_p10 = pnand %p443_p9, %p440_p8 }
  0x18   :  { %448 = shalt.err (!%p445_p10)
}
  0x19   :  { %s449_s6 = scalar_lea.vmem %s517_s15, 4096  ;;  %p454_p12 = scmp.lt.s32.totalorder %s517_s15, %s517_s15 }
  0x1a   :  { %p450_p11 = scmp.ne.s32.totalorder %s517_s15, %s449_s6  ;;  %p455_p13 = scmp.lt.s32.totalorder %s449_s6, %s449_s6 }
  0x1c   :  { %p456_p0 = por %p455_p13, %p454_p12 }
  0x1e   :  { %p457_p1 = pnand %p456_p0, %p450_p11 }
  0x20   :  { %460 = shalt.err (!%p457_p1)
}
  0x21   :  { %s491_s0 = smov 128   ;;  %s492_s7 = smov 8  }
  0x22   :  { %32 = dma.hbm_to_vmem [thread:$0]  %s583_s1, 4096, %s517_s15, [#allocation6], %s491_s0, %s491_s0, %s492_s7  }
  0x23   :  { %483 = dma.done.wait [#allocation3], 128  }
  0x24   :  { %484 = vsyncadd [#allocation3], 4294967168 }
  0x25   :  { %485 = dma.done.wait [#allocation6], 4096  }
  0x26   :  { %486 = vsyncadd [#allocation6], 4294963200  ;;  %v493_v0 = vmov 0.0|0.0   ;;  %vm494_vm0 = vmmov 0   ;;  %v495_v1 = vmov 0.0   ;;  %v42_v2 = vld [vmem:[#allocation5] sm:$0xff] }
  0x27   :  { %361 = vmatprep.subr.bf16.mxu0 %v493_v0  ;;  %323 = vmatprep.mubr.msk.f32.mxu0 %vm494_vm0, %v495_v1  ;;  %v43_v3 = vld [vmem:[#allocation5 + $0x8] sm:$0xff]  ;;  %v44_v4 = vld [vmem:[#allocation5 + $0x10] sm:$0xff]  ;;  %v45_v6 = vld [vmem:[#allocation5 + $0x18] sm:$0xff]  ;;  %s496_s13 = smov [#allocation7]  }
  0x28   :  { %385 = vmatprep.subr.bf16.mxu1 %v493_v0  ;;  %358 = vmatprep.mubr.msk.f32.mxu1 %vm494_vm0, %v495_v1  ;;  %v362_v5 = vpack.c.bf16 %v43_v3, %v42_v2  ;;  %v365_v7 = vpack.c.bf16 %v45_v6, %v44_v4  ;;  %v46_v8 = vld [vmem:[#allocation5 + $0x20] sm:$0xff]  ;;  %v47_v9 = vld [vmem:[#allocation5 + $0x28] sm:$0xff]  ;;  %v141_v12 = vld [vmem:[#allocation5 + $0x90] sm:$0xff]  ;;  %s244_s14 = sshll.u32 %s496_s13, 4  ;;  %s245_s14 = int_to_ptr.vmem [resolvable:$true] %s244_s14 }
  0x29   :  { %v139_v10 = vld [vmem:[#allocation5 + $0x80] sm:$0xff]  ;;  %v140_v11 = vld [vmem:[#allocation5 + $0x88] sm:$0xff]  ;;  %v142_v13 = vld [vmem:[#allocation5 + $0x98] sm:$0xff]  ;;  %v368_v14 = vpack.c.bf16 %v47_v9, %v46_v8  ;;  %s461_s15 = scalar_lea.vmem %s245_s14, 128  ;;  %p466_p3 = scmp.lt.s32.totalorder %s245_s14, %s245_s14 }
  0x2a   :  { %363 = vmatpush3.bf16.msra.mxu0 %v362_v5  ;;  %v386_v15 = vpack.c.bf16 %v140_v11, %v139_v10  ;;  %v48_v16 = vld [vmem:[#allocation5 + $0x30] sm:$0xff]  ;;  %v49_v17 = vld [vmem:[#allocation5 + $0x38] sm:$0xff]  ;;  %v389_v18 = vpack.c.bf16 %v142_v13, %v141_v12  ;;  %v143_v19 = vld [vmem:[#allocation5 + $0xa0] sm:$0xff]  ;;  %p462_p2 = scmp.ne.s32.totalorder %s245_s14, %s461_s15  ;;  %p467_p4 = scmp.lt.s32.totalorder %s461_s15, %s461_s15 }
  0x2b   :  { %364 = vmatprep.subr.bf16.mxu0 %v493_v0  ;;  %v144_v20 = vld [vmem:[#allocation5 + $0xa8] sm:$0xff]  ;;  %v371_v21 = vpack.c.bf16 %v49_v17, %v48_v16  ;;  %v50_v22 = vld [vmem:[#allocation5 + $0x40] sm:$0xff]  ;;  %v145_v25 = vld [vmem:[#allocation5 + $0xb0] sm:$0xff] }
  0x2c   :  { %387 = vmatpush3.bf16.msra.mxu1 %v386_v15  ;;  %v51_v23 = vld [vmem:[#allocation5 + $0x48] sm:$0xff]  ;;  %v392_v24 = vpack.c.bf16 %v144_v20, %v143_v19  ;;  %v146_v26 = vld [vmem:[#allocation5 + $0xb8] sm:$0xff]  ;;  %v52_v28 = vld [vmem:[#allocation5 + $0x50] sm:$0xff]  ;;  %p468_p5 = por %p467_p4, %p466_p3 }
  0x2d   :  { %388 = vmatprep.subr.bf16.mxu1 %v493_v0  ;;  %v374_v27 = vpack.c.bf16 %v51_v23, %v50_v22  ;;  %v53_v29 = vld [vmem:[#allocation5 + $0x58] sm:$0xff]  ;;  %v395_v30 = vpack.c.bf16 %v146_v26, %v145_v25  ;;  %v147_v31 = vld [vmem:[#allocation5 + $0xc0] sm:$0xff]  ;;  %v148_v32 = vld [vmem:[#allocation5 + $0xc8] sm:$0xff] }
  0x2e   :  { %366 = vmatpush3.bf16.msra.mxu0 %v365_v7  ;;  %v377_v33 = vpack.c.bf16 %v53_v29, %v52_v28  ;;  %v54_v34 = vld [vmem:[#allocation5 + $0x60] sm:$0xff]  ;;  %v55_v35 = vld [vmem:[#allocation5 + $0x68] sm:$0xff]  ;;  %v398_v36 = vpack.c.bf16 %v148_v32, %v147_v31  ;;  %v149_v37 = vld [vmem:[#allocation5 + $0xd0] sm:$0xff]  ;;  %p469_p6 = pnand %p468_p5, %p462_p2 }
  0x2f   :  { %367 = vmatprep.subr.bf16.mxu0 %v493_v0  ;;  %v150_v38 = vld [vmem:[#allocation5 + $0xd8] sm:$0xff]  ;;  %v380_v39 = vpack.c.bf16 %v55_v35, %v54_v34  ;;  %v56_v40 = vld [vmem:[#allocation5 + $0x70] sm:$0xff]  ;;  %v151_v45 = vld [vmem:[#allocation5 + $0xe0] sm:$0xff] }
  0x30   :  { %390 = vmatpush3.bf16.msra.mxu1 %v389_v18  ;;  %v57_v41 = vld [vmem:[#allocation5 + $0x78] sm:$0xff]  ;;  %v401_v42 = vpack.c.bf16 %v150_v38, %v149_v37  ;;  %v152_v46 = vld [vmem:[#allocation5 + $0xe8] sm:$0xff]  ;;  %v153_v48 = vld [vmem:[#allocation5 + $0xf0] sm:$0xff] }
  0x31   :  { %391 = vmatprep.subr.bf16.mxu1 %v493_v0  ;;  %v383_v43 = vpack.c.bf16 %v57_v41, %v56_v40  ;;  %v41_v44 = vld [vmem:[#allocation2] sm:$0xff]  ;;  %v404_v47 = vpack.c.bf16 %v152_v46, %v151_v45 }
  0x32   :  { %369 = vmatpush3.bf16.msra.mxu0 %v368_v14  ;;  %v154_v49 = vld [vmem:[#allocation5 + $0xf8] sm:$0xff] }
  0x33   :  { %370 = vmatprep.subr.bf16.mxu0 %v493_v0  ;;  %v407_v50 = vpack.c.bf16 %v154_v49, %v153_v48  ;;  %v254_v51 = vld [vmem:[%s584_s2] ss:$0 sm:$0xff]  ;;  %v256_v58 = vld [vmem:[%s584_s2 + $0x1] ss:$0 sm:$0xff] }
  0x34   :  { %393 = vmatpush3.bf16.msra.mxu1 %v392_v24 }
  0x35   :  { %394 = vmatprep.subr.bf16.mxu1 %v493_v0 }
  0x36   :  { %372 = vmatpush3.bf16.msra.mxu0 %v371_v21 }
  0x37   :  { %373 = vmatprep.subr.bf16.mxu0 %v493_v0 }
  0x38   :  { %396 = vmatpush3.bf16.msra.mxu1 %v395_v30 }
  0x39   :  { %397 = vmatprep.subr.bf16.mxu1 %v493_v0 }
  0x3a   :  { %375 = vmatpush3.bf16.msra.mxu0 %v374_v27 }
  0x3b   :  { %376 = vmatprep.subr.bf16.mxu0 %v493_v0 }
  0x3c   :  { %399 = vmatpush3.bf16.msra.mxu1 %v398_v36 }
  0x3d   :  { %400 = vmatprep.subr.bf16.mxu1 %v493_v0 }
  0x3e   :  { %378 = vmatpush3.bf16.msra.mxu0 %v377_v33 }
  0x3f   :  { %379 = vmatprep.subr.bf16.mxu0 %v493_v0 }
  0x40   :  { %402 = vmatpush3.bf16.msra.mxu1 %v401_v42 }
  0x41   :  { %403 = vmatprep.subr.bf16.mxu1 %v493_v0 }
  0x42   :  { %381 = vmatpush3.bf16.msra.mxu0 %v380_v39 }
  0x43   :  { %382 = vmatprep.subr.bf16.mxu0 %v493_v0 }
  0x44   :  { %405 = vmatpush3.bf16.msra.mxu1 %v404_v47 }
  0x45   :  { %406 = vmatprep.subr.bf16.mxu1 %v493_v0 }
  0x46   :  { %384 = vmatpush3.bf16.msra.mxu0 %v383_v43 }
  0x48   :  { %408 = vmatpush3.bf16.msra.mxu1 %v407_v50 }
  0x49   :  { %324 = vmatmul.mubr.f32.vlgmr.msra.gmra.mrb[0].mxu0 %v41_v44 }
 0x11c   :  { %v131_v52 = vpop.f32.mrb[0].mxu0 }
 0x11d   :  { %v132_v53 = vadd.f32 %v254_v51, %v131_v52  ;;  %v325_v54 = vpop.f32.mrb[1].mxu0 }
 0x11f   :  { %v135_v55 = vmax.f32 %v132_v53, 0.0 }
 0x121   :  { %v136_v56 = vmul.f32 %v135_v55, %v135_v55 }
 0x123   :  { %v137_v57 = vmul.f32 %v136_v56, %v135_v55 }
 0x125   :  { %359 = vmatmul.mubr.f32.vlgmr.msra.gmra.mrb[0].mxu1 %v137_v57 }
 0x1f8   :  { %v229_v59 = vpop.f32.mrb[0].mxu1 }
 0x1f9   :  { %v230_v60 = vadd.f32 %v256_v58, %v229_v59  ;;  %v360_v61 = vpop.f32.mrb[1].mxu1 }
 0x1fb   :  { %v233_v62 = vmax.f32 %v230_v60, 0.0 }
 0x1fd   :  { %v234_v63 = vmul.f32 %v233_v62, %v233_v62 }
 0x1ff   :  { %v235_v0 = vmul.f32 %v234_v63, %v233_v62 }
 0x201   :  { %v236_v1 = vadd.f32 %v235_v0, %v41_v44 }
 0x203   :  { %237 = vst [vmem:[#allocation7] sm:$0xff] %v236_v1 }
 0x204   :  { %472 = shalt.err (!%p469_p6)
}
 0x205   :  { %s473_s17 = scalar_lea.hbm %s585_s3, 128 }
 0x206   :  { %p474_p7 = scmp.ne.s32.totalorder %s585_s3, %s473_s17  ;;  %p477_p8 = scmp.lt.u32.totalorder %s473_s17, %s585_s3 }
 0x208   :  { %p479_p9 = pnand %p477_p8, %p474_p7 }
 0x20a   :  { %482 = shalt.err (!%p479_p9)
}
 0x20b   :  { %247 = dma.vmem_to_hbm [thread:$0]  %s245_s14, 128, %s585_s3, [#allocation4]  }
 0x20c   :  { %487 = dma.done.wait [#allocation4], 128  }
 0x20d   :  { %488 = vsyncadd [#allocation4], 4294967168 }
 0x20e   :  { %251 = vsyncpa [#allocation3], 1 }
 0x20f   :  { %252 = vsyncpa [#allocation6], 1 }
 0x210   :  { %253 = vsyncpa [#allocation4], 1 }

// kernel: tpu_custom_call.1
= control target key start
LH: loop header
LB: loop body
LE: loop exit
PB: predicated region body
PF: predicated region fallthrough
CT: control target
= control target key end

     0   :  { %8 = vsyncpa [#allocation4], 0  ;;  %s1005_s0 = inlined_call_operand.hbm [shape: f32[8,128], index: 0, kind: input, shape index: {}]   ;;  %s1006_s1 = inlined_call_operand.hbm [shape: f32[2,128,128], index: 1, kind: input, shape index: {}]   ;;  %s1007_s2 = inlined_call_operand.vmem [shape: f32[2,1,128], index: 2, kind: input, shape index: {}]   ;;  %s1008_s3 = inlined_call_operand.hbm [shape: f32[8,128], index: 3, kind: output, shape index: {}]  }
   0x1   :  { %9 = vsyncpa [#allocation7], 0 }
   0x2   :  { %11 = vsyncpa [#allocation7 + $0x1], 0 }
   0x3   :  { %12 = vsyncpa [#allocation5], 0  ;;  %s777_s12 = smov 0   ;;  %s779_s13 = smov 0  }
   0x4   :  { %s781_s14 = smov 0   ;;  %s783_s15 = smov 0  }
   0x5   :  { %s785_s16 = smov 0   ;;  %s787_s17 = smov 0  }
   0x6 LB: > { %s433_s18 = sadd.s32 4294967295, %s747_s17   ;;  %s63_s19 = sadd.s32 1, %s735_s14  ;;  %s747_s17 = sphi %s787_s17, %s18_s17   ;;  %s743_s16 = sphi %s785_s16, %s1029_s16   ;;  %s739_s15 = sphi %s783_s15, %s1028_s15   ;;  %s735_s14 = sphi %s781_s14, %s1027_s14   ;;  %s731_s13 = sphi %s779_s13, %s1026_s13   ;;  %s727_s12 = sphi %s777_s12, %s1025_s12  }
   0x7   : > { %p70_p0 = scmp.ne.s32.totalorder %s735_s14, %s731_s13  ;;  %p71_p1 = scmp.eq.s32.totalorder %s747_s17, 0 }
   0x8   : > { %p76_p2 = scmp.ne.s32.totalorder %s731_s13, %s727_s12  ;;  %p813_p3 = scmp.eq.s32.totalorder %s433_s18, 0 }
   0x9   : > { %p72_p4 = por %p71_p1, %p70_p0  ;;  %p434_p5 = scmp.ge.s32.totalorder %s747_s17, 1 }
   0xa   : > { %s1014_s20 = scalar_select %p813_p3, 1, 0 }
   0xb   : > { %p820_p6 = por %p813_p3, %p76_p2  ;;  %p139_p7 = scmp.lt.s32.totalorder %s747_s17, 3 }
   0xc   : > { %s749_s23 = smov [#allocation3]   ;;  %p546_p10 = scmp.lt.s32.totalorder %s747_s17, 2 }
   0xd   : > { %s1015_s21 = scalar_select %p820_p6, 1, 0 }
   0xe   : > { %p825_p8 = pnand %p434_p5, %p139_p7  ;;  %s154_s24 = sshll.u32 %s749_s23, 4  ;;  %s155_s24 = int_to_ptr.vmem [resolvable:$true] %s154_s24 }
   0xf   : > { %s165_s25 = sand.u32 1, %s735_s14   ;;  %p839_p12 = pnand %p546_p10, %p72_p4 }
  0x10   : > { %s1016_s22 = scalar_select %p825_p8, 1, 0 }
  0x11   : > { %p537_p9 = pneg %p825_p8  ;;  %s605_s30 = scalar_lea.hbm %s1005_s0, 128 }
  0x12   : > { %s1018_s27 = scalar_select %p839_p12, 1, 0 }
  0x13   : > { %p835_p11 = pnand %p537_p9, %p813_p3  ;;  %p606_p13 = scmp.ne.s32.totalorder %s1005_s0, %s605_s30 }
  0x14   : > { %p612_p5 = scmp.lt.u32.totalorder %s605_s30, %s1005_s0 }
  0x15   : > { %p607_p0 = pneg %p835_p11 }
  0x17   : > { %p608_p1 = pnand %p607_p0, %p606_p13 }
  0x19   : > { %p609_p2 = pneg %p608_p1 }
  0x1b   : > { %p614_p4 = pnand %p612_p5, %p609_p2 }
  0x1d   : > { %617 = shalt.err (!%p614_p4)
}
  0x1e   : > { %s618_s8 = scalar_lea.vmem %s155_s24, 128  ;;  %p626_p6 = scmp.lt.s32.totalorder %s155_s24, %s155_s24 }
  0x1f   : > { %p619_p7 = scmp.ne.s32.totalorder %s155_s24, %s618_s8  ;;  %p627_p3 = scmp.lt.s32.totalorder %s618_s8, %s618_s8 }
  0x21   : > { %p621_p9 = pnand %p619_p7, %p607_p0  ;;  %p628_p8 = por %p627_p3, %p626_p6 }
  0x23   : > { %p622_p10 = pneg %p621_p9 }
  0x25   : > { %p629_p12 = pnand %p628_p8, %p622_p10 }
  0x27   : > { %632 = shalt.err (!%p629_p12)
}
  0x28   : > { %540 = dma.hbm_to_vmem [thread:$0]  (!%p835_p11), %s1005_s0, 128, %s155_s24, [#allocation4]  }
  0x29   : > { %s27_s11 = sadd.s32 1, %s743_s16  ;;  %s437_s12 = sshll.u32 %s165_s25, 7 }
  0x2a   : > { %p28_p13 = scmp.ge.s32.totalorder %s27_s11, 2  ;;  %s450_s23 = sshll.u32 %s743_s16, 11 }
  0x2b   : > { %s169_s28 = scalar_lea.vmem [#allocation6], %s437_s12  ;;  %s868_s4 = scalar_lea.hbm %s1006_s1, %s450_s23 }
  0x2c   : > { %s176_s29 = sshll.u32 %s169_s28, 4  ;;  %s1031_s11 = smov (%p28_p13, %s27_s11), 0  ;;  %s870_s29 = int_to_ptr.vmem [resolvable:$true] %s176_s29 }
  0x2d   : > { %s60_s24 = ssub.s32 %s743_s16, %s1031_s11  ;;  %s880_s6 = scalar_lea.sflag [#allocation7], %s165_s25 }
  0x2e   : > { %p874_p3 = scmp.eq.s32.totalorder %s60_s24, 0  ;;  %s633_s7 = scalar_lea.hbm %s868_s4, 2048 }
  0x2f   : > { %p634_p6 = scmp.ne.s32.totalorder %s868_s4, %s633_s7  ;;  %p1020_p8 = scmp.ne.s32.totalorder %s1018_s27, 0 }
  0x30   : > { %s638_s10 = scalar_lea.hbm %s1006_s1, 4096  ;;  %p639_p1 = scmp.lt.u32.totalorder %s868_s4, %s1006_s1 }
  0x31   : > { %p635_p11 = pneg %p1020_p8  ;;  %p640_p2 = scmp.lt.u32.totalorder %s638_s10, %s633_s7 }
  0x32   : > { %p642_p4 = scmp.lt.u32.totalorder %s633_s7, %s868_s4 }
  0x33   : > { %p636_p12 = pnand %p635_p11, %p634_p6  ;;  %p641_p5 = por %p640_p2, %p639_p1 }
  0x35   : > { %p637_p0 = pneg %p636_p12  ;;  %p643_p7 = por %p642_p4, %p641_p5 }
  0x37   : > { %p644_p9 = pnand %p643_p7, %p637_p0 }
  0x39   : > { %647 = shalt.err (!%p644_p9)
}
  0x3a   : > { %s648_s25 = scalar_lea.vmem %s870_s29, 2048  ;;  %s750_s28 = smov [#allocation6]  }
  0x3b   : > { %p649_p10 = scmp.ne.s32.totalorder %s870_s29, %s648_s25  ;;  %s653_s26 = sshll.u32 %s750_s28, 4  ;;  %s654_s26 = int_to_ptr.vmem [resolvable:$false] %s653_s26 }
  0x3c   : > { %s655_s30 = scalar_lea.vmem %s654_s26, 4096  ;;  %p656_p12 = scmp.lt.s32.totalorder %s870_s29, %s654_s26 }
  0x3d   : > { %p651_p13 = pnand %p649_p10, %p635_p11  ;;  %p657_p1 = scmp.lt.s32.totalorder %s655_s30, %s648_s25 }
  0x3f   : > { %p652_p6 = pneg %p651_p13  ;;  %p658_p2 = por %p657_p1, %p656_p12 }
  0x41   : > { %p659_p5 = pnand %p658_p2, %p652_p6 }
  0x43   : > { %662 = shalt.err (!%p659_p5)
}
  0x44   : > { %s751_s24 = smov 128   ;;  %s752_s7 = smov 8  }
  0x45   : > { %544 = dma.hbm_to_vmem [thread:$0]  (!%p1020_p8), %s868_s4, 2048, %s870_s29, %s880_s6, %s751_s24, %s751_s24, %s752_s7  }
  0x46   : > { %s913_s8 = scalar_select %p874_p3, %s735_s14, %s63_s19  }
  0x47   : > { %p1021_p11 = scmp.ne.s32.totalorder %s1016_s22, 0 }
  0x48   : > { %p1022_p0 = scmp.ne.s32.totalorder (!%p1021_p11), %s1014_s20, 0 }
  0x49   : > { %194 = sbr.rel (%p1021_p11) target bundleno = 385 (0x181), region = 32 }
  0x50   : > { %714 = dma.done.wait (%p1022_p0), [#allocation4], 128  }
  0x51   : > { %716 = vsyncadd (%p1022_p0), [#allocation4], 4294967168  ;;  %s200_s9 = sand.u32 1, %s731_s13   ;;  %p1023_p8 = scmp.ne.s32.totalorder %s1015_s21, 0 }
  0x52   : > { %s442_s10 = sshll.u32 %s200_s9, 7  ;;  %s201_s12 = scalar_lea.sflag [#allocation7], %s200_s9 }
  0x53   : > { %s922_s27 = scalar_lea.vmem [#allocation6], %s442_s10 }
  0x54   : > { %718 = dma.done.wait (%p1023_p8), %s201_s12, 2048  }
  0x55   : > { %720 = vsyncadd (%p1023_p8), %s201_s12, 4294965248  ;;  %p225_p3 = scmp.lt.s32.totalorder %s739_s15, 1  ;;  %p443_p4 = scmp.ne.s32.totalorder %s739_s15, 0 }
  0x56   : > { %v232_v0 = vld [vmem:[#allocation3] sm:$0xff] (!%p443_p4) }
  0x57   : > { %s930_s19 = scalar_select %p225_p3, %s739_s15, 1 }
  0x58   : > { %231 = sbr.rel (%p443_p4) target bundleno = 95 (0x5f), region = 44  ;;  %233 = vst [vmem:[#allocation2] sm:$0xff] (!%p443_p4), %v232_v0 }
  0x59   : > { %s227_s29 = scalar_lea.vmem %s1007_s2, %s930_s19 }
  0x5f PF: > { %v235_v1 = vld [vmem:[%s922_s27] sm:$0xff]  ;;  %v236_v2 = vld [vmem:[%s922_s27 + $0x8] sm:$0xff]  ;;  %v237_v3 = vld [vmem:[%s922_s27 + $0x10] sm:$0xff]  ;;  %v753_v4 = vmov 0.0|0.0   ;;  %vm754_vm0 = vmmov 0   ;;  %v755_v7 = vmov 0.0  }
  0x60   : > { %503 = vmatprep.subr.bf16.mxu0 %v753_v4  ;;  %v504_v5 = vpack.c.bf16 %v236_v2, %v235_v1  ;;  %v238_v6 = vld [vmem:[%s922_s27 + $0x18] sm:$0xff]  ;;  %500 = vmatprep.mubr.msk.f32.mxu0 %vm754_vm0, %v755_v7  ;;  %v239_v9 = vld [vmem:[%s922_s27 + $0x20] sm:$0xff]  ;;  %v240_v10 = vld [vmem:[%s922_s27 + $0x28] sm:$0xff]  ;;  %p445_p7 = scmp.ne.s32.totalorder %s739_s15, 1 }
  0x61   : > { %v507_v8 = vpack.c.bf16 %v238_v6, %v237_v3  ;;  %v510_v11 = vpack.c.bf16 %v240_v10, %v239_v9  ;;  %v241_v12 = vld [vmem:[%s922_s27 + $0x30] sm:$0xff]  ;;  %v242_v13 = vld [vmem:[%s922_s27 + $0x38] sm:$0xff]  ;;  %v243_v15 = vld [vmem:[%s922_s27 + $0x40] sm:$0xff] }
  0x62   : > { %505 = vmatpush3.bf16.msra.mxu0 %v504_v5  ;;  %v513_v14 = vpack.c.bf16 %v242_v13, %v241_v12  ;;  %v244_v16 = vld [vmem:[%s922_s27 + $0x48] sm:$0xff]  ;;  %v245_v18 = vld [vmem:[%s922_s27 + $0x50] sm:$0xff]  ;;  %v246_v19 = vld [vmem:[%s922_s27 + $0x58] sm:$0xff] }
  0x63   : > { %506 = vmatprep.subr.bf16.mxu0 %v753_v4  ;;  %v516_v17 = vpack.c.bf16 %v244_v16, %v243_v15  ;;  %v519_v20 = vpack.c.bf16 %v246_v19, %v245_v18  ;;  %v247_v21 = vld [vmem:[%s922_s27 + $0x60] sm:$0xff]  ;;  %v248_v22 = vld [vmem:[%s922_s27 + $0x68] sm:$0xff]  ;;  %v249_v24 = vld [vmem:[%s922_s27 + $0x70] sm:$0xff] }
  0x64   : > { %v522_v23 = vpack.c.bf16 %v248_v22, %v247_v21  ;;  %v250_v25 = vld [vmem:[%s922_s27 + $0x78] sm:$0xff]  ;;  %v234_v27 = vld [vmem:[#allocation2] sm:$0xff] }
  0x65   : > { %v525_v26 = vpack.c.bf16 %v250_v25, %v249_v24  ;;  %v444_v28 = vld [vmem:[%s227_s29] ss:$0 sm:$0xff]  ;;  %v336_v35 = vld [vmem:[#allocation3] sm:$0xff] (!%p445_p7) }
  0x66   : > { %508 = vmatpush3.bf16.msra.mxu0 %v507_v8 }
  0x67   : > { %509 = vmatprep.subr.bf16.mxu0 %v753_v4 }
  0x6a   : > { %511 = vmatpush3.bf16.msra.mxu0 %v510_v11 }
  0x6b   : > { %512 = vmatprep.subr.bf16.mxu0 %v753_v4 }
  0x6e   : > { %514 = vmatpush3.bf16.msra.mxu0 %v513_v14 }
  0x6f   : > { %515 = vmatprep.subr.bf16.mxu0 %v753_v4 }
  0x72   : > { %517 = vmatpush3.bf16.msra.mxu0 %v516_v17 }
  0x73   : > { %518 = vmatprep.subr.bf16.mxu0 %v753_v4 }
  0x76   : > { %520 = vmatpush3.bf16.msra.mxu0 %v519_v20 }
  0x77   : > { %521 = vmatprep.subr.bf16.mxu0 %v753_v4 }
  0x7a   : > { %523 = vmatpush3.bf16.msra.mxu0 %v522_v23 }
  0x7b   : > { %524 = vmatprep.subr.bf16.mxu0 %v753_v4 }
  0x7e   : > { %526 = vmatpush3.bf16.msra.mxu0 %v525_v26 }
  0x81   : > { %501 = vmatmul.mubr.f32.vlgmr.msra.gmra.mrb[0].mxu0 %v234_v27 }
 0x154   : > { %v324_v29 = vpop.f32.mrb[0].mxu0 }
 0x155   : > { %v325_v30 = vadd.f32 %v444_v28, %v324_v29  ;;  %v502_v31 = vpop.f32.mrb[1].mxu0 }
 0x157   : > { %v328_v32 = vmax.f32 %v325_v30, 0.0  ;;  %335 = sbr.rel (%p445_p7) target bundleno = 360 (0x168), region = 48 }
 0x159   : > { %v329_v33 = vmul.f32 %v328_v32, %v328_v32 }
 0x15b   : > { %v330_v34 = vmul.f32 %v329_v33, %v328_v32 }
 0x15d   : > { %331 = vst [vmem:[#allocation2] sm:$0xff] %v330_v34 }
 0x164   : > { %v337_v36 = vld [vmem:[#allocation2] sm:$0xff] }
 0x165   : > { %v338_v37 = vadd.f32 %v337_v36, %v336_v35 }
 0x167   : > { %339 = vst [vmem:[#allocation8] sm:$0xff] %v338_v37 }
 0x168 PF: > { %p961_p9 = scmp.eq.s32.totalorder %s433_s18, 1  ;;  %s756_s6 = smov [#allocation8]  }
 0x169   : > { %s349_s23 = sshll.u32 %s756_s6, 4  ;;  %s350_s23 = int_to_ptr.vmem [resolvable:$true] %s349_s23 }
 0x16a   : > { %s663_s25 = scalar_lea.vmem %s350_s23, 128  ;;  %p670_p12 = scmp.lt.s32.totalorder %s350_s23, %s350_s23 }
 0x16b   : > { %p664_p10 = scmp.ne.s32.totalorder %s350_s23, %s663_s25  ;;  %p671_p1 = scmp.lt.s32.totalorder %s663_s25, %s663_s25 }
 0x16d   : > { %p665_p13 = pnand %p664_p10, %p961_p9  ;;  %p672_p2 = por %p671_p1, %p670_p12 }
 0x16f   : > { %p666_p6 = pneg %p665_p13 }
 0x171   : > { %p673_p5 = pnand %p672_p2, %p666_p6 }
 0x173   : > { %676 = shalt.err (!%p673_p5)
}
 0x174   : > { %s677_s18 = scalar_lea.hbm %s1008_s3, 128 }
 0x175   : > { %p678_p11 = scmp.ne.s32.totalorder %s1008_s3, %s677_s18  ;;  %p683_p3 = scmp.lt.u32.totalorder %s677_s18, %s1008_s3 }
 0x177   : > { %p679_p0 = pnand %p678_p11, %p961_p9 }
 0x179   : > { %p680_p8 = pneg %p679_p0 }
 0x17b   : > { %p685_p4 = pnand %p683_p3, %p680_p8 }
 0x17d   : > { %688 = shalt.err (!%p685_p4)
}
 0x17e   : > { %534 = dma.vmem_to_hbm [thread:$0]  (%p961_p9), %s350_s23, 128, %s1008_s3, [#allocation5]  }
 0x17f   : > { %722 = dma.done.wait (%p961_p9), [#allocation5], 128  }
 0x180   : > { %724 = vsyncadd (%p961_p9), [#allocation5], 4294967168 }
 0x181 PF: > { %s18_s17 = sadd.s32 1, %s747_s17   ;;  %s1025_s12 = smov %s731_s13 }
 0x182   : > { %p15_p7 = scmp.ge.s32.totalorder %s18_s17, 4   ;;  %s1026_s13 = smov %s735_s14 }
 0x183   : > { %s1027_s14 = smov %s913_s8  ;;  %s1028_s15 = smov %s743_s16 }
 0x184   : > { %s1029_s16 = smov %s1031_s11  ;;  %17 = sbr.rel (!%p15_p7) target bundleno = 6 (0x6), region = 87 }
 0x18b   :  { %362 = vsyncpa [#allocation4], 1 }
 0x18c   :  { %364 = vsyncpa [#allocation4 + $0x1], 1 }
 0x18d   :  { %365 = vsyncpa [#allocation7], 1 }
 0x18e   :  { %367 = vsyncpa [#allocation7 + $0x1], 1 }
 0x18f   :  { %368 = vsyncpa [#allocation5], 1 }
 0x190   :  { %370 = vsyncpa [#allocation5 + $0x1], 1 }

</bundles_post_ra>
